<compile_context>
chip_gen: v7x
topology: tpu7x:2x2x1
jax: 0.10.0
libtpu: 0.0.40
codegen_flags: <defaults>
</compile_context>

<pallas_src>
import functools

import jax
import jax.numpy as jnp
from jax.experimental import pallas as pl
from jax.experimental.pallas import tpu as pltpu


HIDDEN = 256
LANE = 128
SUBLANE = 8
MAX_TB = 256          # batch-tile rows; multiple of 8/128/256 friendly, tiny VMEM use


def _round_up(v, m):
    return (v + m - 1) // m * m


def _critic_kernel(x_ref, a_ref, w1x_ref, w1a_ref, b1_ref,
                   w2_ref, b2_ref, w3_ref, b3_ref, wq_ref, bq_ref,
                   out_ref, *, inv_max_action):
    # ---- layer 1: fused concat -> two dots (small K; kept in f32, cost is tiny) ----
    x = x_ref[...]                                    # (TB, obs+goal) f32
    a = a_ref[...] * inv_max_action                   # (TB, action)   f32
    h = (jnp.dot(x, w1x_ref[...], preferred_element_type=jnp.float32)
         + jnp.dot(a, w1a_ref[...], preferred_element_type=jnp.float32)
         + b1_ref[...])
    h = jnp.maximum(h, 0.0)

    # ---- layers 2/3: bf16 operands on the MXU, f32 accumulate, f32 bias/ReLU ----
    h = jnp.dot(h.astype(jnp.bfloat16), w2_ref[...],
                preferred_element_type=jnp.float32) + b2_ref[...]
    h = jnp.maximum(h, 0.0)

    h = jnp.dot(h.astype(jnp.bfloat16), w3_ref[...],
                preferred_element_type=jnp.float32) + b3_ref[...]
    h = jnp.maximum(h, 0.0)

    # ---- q head: wq padded to 128 lanes (only column 0 is real, rest are zero) ----
    out_ref[...] = jnp.dot(h.astype(jnp.bfloat16), wq_ref[...],
                           preferred_element_type=jnp.float32) + bq_ref[...]


@functools.partial(jax.jit, static_argnames=("max_action",))
def critic_forward(x, actions, params, max_action):
    """Equivalent of critic.forward(x, actions) -> q_value of shape [B, 1]."""
    B, in_x = x.shape
    in_a = actions.shape[1]
    x = x.astype(jnp.float32)
    actions = actions.astype(jnp.float32)

    # batch tile: multiple of 8, capped at MAX_TB (tiny VMEM footprint per tile)
    TB = min(MAX_TB, _round_up(max(B, SUBLANE), SUBLANE))
    B_pad = _round_up(B, TB)
    if B_pad != B:
        x = jnp.pad(x, ((0, B_pad - B), (0, 0)))
        actions = jnp.pad(actions, ((0, B_pad - B), (0, 0)))

    (w1x, w1a, b1, w2, b2, w3, b3, wq, bq) = params

    def row_block(ncols):
        return pl.BlockSpec((TB, ncols), lambda i: (i, 0))

    def resident(arr):
        # whole array as one block, same block every grid step -> stays in VMEM
        return pl.BlockSpec(arr.shape, lambda i: (0, 0))

    flops = 2 * B_pad * (in_x * HIDDEN + in_a * HIDDEN
                         + 2 * HIDDEN * HIDDEN + HIDDEN * LANE)
    weight_bytes = sum(int(p.size) * p.dtype.itemsize for p in params)
    bytes_accessed = (int(x.size) * 4 + int(actions.size) * 4
                      + weight_bytes + B_pad * LANE * 4)

    kernel = functools.partial(_critic_kernel,
                               inv_max_action=float(1.0 / max_action))

    out = pl.pallas_call(
        kernel,
        out_shape=jax.ShapeDtypeStruct((B_pad, LANE), jnp.float32),
        grid=(B_pad // TB,),
        in_specs=[
            row_block(in_x), row_block(in_a),
            resident(w1x), resident(w1a), resident(b1),
            resident(w2), resident(b2),
            resident(w3), resident(b3),
            resident(wq), resident(bq),
        ],
        out_specs=row_block(LANE),
        compiler_params=pltpu.CompilerParams(
            dimension_semantics=("parallel",)),
        cost_estimate=pl.CostEstimate(
            flops=flops, transcendentals=0, bytes_accessed=bytes_accessed),
    )(x, actions, w1x, w1a, b1, w2, b2, w3, b3, wq, bq)

    return out[:B, :1]


def make_params(key, obs, goal, action):
    """nn.Linear-style init U(-1/sqrt(fan_in), +1/sqrt(fan_in)).

    Returns (kernel_params, raw_params):
      kernel_params: fc1 split into (w1_x, w1_a) [f32]; fc2/fc3/q_out weights in
                     bf16; q_out padded to 128 output lanes; biases f32 [1, n].
      raw_params:    plain f32 tensors for the pure-JAX reference.
    """
    def linear(k, fan_in, fan_out):
        kw, kb = jax.random.split(k)
        bound = float(1.0 / (fan_in ** 0.5))
        w = jax.random.uniform(kw, (fan_in, fan_out), jnp.float32, -bound, bound)
        b = jax.random.uniform(kb, (fan_out,), jnp.float32, -bound, bound)
        return w, b

    in_x = obs + goal
    k1, k2, k3, k4 = jax.random.split(key, 4)
    w1, b1 = linear(k1, in_x + action, HIDDEN)
    w2, b2 = linear(k2, HIDDEN, HIDDEN)
    w3, b3 = linear(k3, HIDDEN, HIDDEN)
    wq, bq = linear(k4, HIDDEN, 1)

    wq_p = jnp.zeros((HIDDEN, LANE), jnp.float32).at[:, :1].set(wq)
    bq_p = jnp.zeros((1, LANE), jnp.float32).at[0, :1].set(bq)

    kernel_params = (
        w1[:in_x, :], w1[in_x:, :], b1.reshape(1, HIDDEN),
        w2.astype(jnp.bfloat16), b2.reshape(1, HIDDEN),
        w3.astype(jnp.bfloat16), b3.reshape(1, HIDDEN),
        wq_p.astype(jnp.bfloat16), bq_p,
    )
    raw_params = (w1, b1, w2, b2, w3, b3, wq, bq)
    return kernel_params, raw_params


def reference_forward(x, actions, raw_params, max_action):
    """Pure-JAX f32 reference identical to the PyTorch forward."""
    (w1, b1, w2, b2, w3, b3, wq, bq) = raw_params
    h = jnp.concatenate([x, actions / max_action], axis=1)
    h = jax.nn.relu(h @ w1 + b1)
    h = jax.nn.relu(h @ w2 + b2)
    h = jax.nn.relu(h @ w3 + b3)
    return h @ wq + bq


if __name__ == "__main__":
    # env_params: obs=10, goal=5, action=4, action_max=2.0
    OBS, GOAL, ACTION = 10, 5, 4
    MAX_ACTION = 2.0

    key = jax.random.PRNGKey(0)
    kp, kdata = jax.random.split(key)
    kernel_params, raw_params = make_params(kp, OBS, GOAL, ACTION)

    # B=2: single-block grid.  B=300: multi-block grid with a padded tail.
    for B in (2, 300):
        kx, ka = jax.random.split(jax.random.fold_in(kdata, B))
        x = jax.random.normal(kx, (B, OBS + GOAL), jnp.float32)
        actions = jax.random.normal(ka, (B, ACTION), jnp.float32) * MAX_ACTION

        q = jax.block_until_ready(
            critic_forward(x, actions, kernel_params, MAX_ACTION))
        assert q.shape == (B, 1), q.shape

        q_ref = reference_forward(x, actions, raw_params, MAX_ACTION)
        # bf16 weights/activations on the hidden layers -> loosened tolerance vs f32.
        assert jnp.allclose(q, q_ref, atol=5e-2, rtol=5e-2), (
            float(jnp.max(jnp.abs(q - q_ref))))

    print("KERNEL_OK")
</pallas_src>

<mosaic_0001>
module attributes {stable_mosaic.version = 11 : i64} {
  func.func @_critic_kernel(%arg0: i32, %arg1: memref<8x15xf32, #tpu.memory_space<vmem>>, %arg2: memref<8x4xf32, #tpu.memory_space<vmem>>, %arg3: memref<15x256xf32, #tpu.memory_space<vmem>>, %arg4: memref<4x256xf32, #tpu.memory_space<vmem>>, %arg5: memref<1x256xf32, #tpu.memory_space<vmem>>, %arg6: memref<256x256xbf16, #tpu.memory_space<vmem>>, %arg7: memref<1x256xf32, #tpu.memory_space<vmem>>, %arg8: memref<256x256xbf16, #tpu.memory_space<vmem>>, %arg9: memref<1x256xf32, #tpu.memory_space<vmem>>, %arg10: memref<256x128xbf16, #tpu.memory_space<vmem>>, %arg11: memref<1x128xf32, #tpu.memory_space<vmem>>, %arg12: memref<8x128xf32, #tpu.memory_space<vmem>>) attributes {dimension_semantics = [#tpu.dimension_semantics<parallel>], iteration_bounds = array<i64: 1>, scalar_prefetch = 0 : i64, scratch_operands = 0 : i64, tpu.core_type = #tpu.core_type<tc>, window_params = [{transform_indices = @transform_0, window_bounds = array<i64: 8, 15>}, {transform_indices = @transform_1, window_bounds = array<i64: 8, 4>}, {pipeline_mode = #tpu.pipeline_mode<synchronous>, transform_indices = @transform_2, window_bounds = array<i64: 15, 256>}, {pipeline_mode = #tpu.pipeline_mode<synchronous>, transform_indices = @transform_3, window_bounds = array<i64: 4, 256>}, {pipeline_mode = #tpu.pipeline_mode<synchronous>, transform_indices = @transform_4, window_bounds = array<i64: 1, 256>}, {pipeline_mode = #tpu.pipeline_mode<synchronous>, transform_indices = @transform_5, window_bounds = array<i64: 256, 256>}, {pipeline_mode = #tpu.pipeline_mode<synchronous>, transform_indices = @transform_6, window_bounds = array<i64: 1, 256>}, {pipeline_mode = #tpu.pipeline_mode<synchronous>, transform_indices = @transform_7, window_bounds = array<i64: 256, 256>}, {pipeline_mode = #tpu.pipeline_mode<synchronous>, transform_indices = @transform_8, window_bounds = array<i64: 1, 256>}, {pipeline_mode = #tpu.pipeline_mode<synchronous>, transform_indices = @transform_9, window_bounds = array<i64: 256, 128>}, {pipeline_mode = #tpu.pipeline_mode<synchronous>, transform_indices = @transform_10, window_bounds = array<i64: 1, 128>}, {transform_indices = @transform_11, window_bounds = array<i64: 8, 128>}]} {
    %c0 = arith.constant 0 : index
    %c0_0 = arith.constant 0 : index
    %0 = vector.load %arg1[%c0, %c0_0] : memref<8x15xf32, #tpu.memory_space<vmem>>, vector<8x15xf32>
    %c0_1 = arith.constant 0 : index
    %c0_2 = arith.constant 0 : index
    %1 = vector.load %arg2[%c0_1, %c0_2] : memref<8x4xf32, #tpu.memory_space<vmem>>, vector<8x4xf32>
    %cst = arith.constant 5.000000e-01 : f32
    %2 = vector.broadcast %cst : f32 to vector<8x4xf32>
    %3 = arith.mulf %1, %2 : vector<8x4xf32>
    %c0_3 = arith.constant 0 : index
    %c0_4 = arith.constant 0 : index
    %4 = vector.load %arg3[%c0_3, %c0_4] : memref<15x256xf32, #tpu.memory_space<vmem>>, vector<15x256xf32>
    %cst_5 = arith.constant dense<0.000000e+00> : vector<8x256xf32>
    %5 = tpu.matmul %0, %4, %cst_5 {dimension_numbers = #tpu.dot_dimension_numbers<[1], [0], [0], [1], [0, 0, 1, 1], [], []>} : vector<8x15xf32>, vector<15x256xf32>, vector<8x256xf32> -> vector<8x256xf32>
    %c0_6 = arith.constant 0 : index
    %c0_7 = arith.constant 0 : index
    %6 = vector.load %arg4[%c0_6, %c0_7] : memref<4x256xf32, #tpu.memory_space<vmem>>, vector<4x256xf32>
    %cst_8 = arith.constant dense<0.000000e+00> : vector<8x256xf32>
    %7 = tpu.matmul %3, %6, %cst_8 {dimension_numbers = #tpu.dot_dimension_numbers<[1], [0], [0], [1], [0, 0, 1, 1], [], []>} : vector<8x4xf32>, vector<4x256xf32>, vector<8x256xf32> -> vector<8x256xf32>
    %8 = arith.addf %5, %7 : vector<8x256xf32>
    %c0_9 = arith.constant 0 : index
    %c0_10 = arith.constant 0 : index
    %9 = vector.load %arg5[%c0_9, %c0_10] : memref<1x256xf32, #tpu.memory_space<vmem>>, vector<1x256xf32>
    %10 = vector.broadcast %9 : vector<1x256xf32> to vector<8x256xf32>
    %11 = arith.addf %8, %10 : vector<8x256xf32>
    %cst_11 = arith.constant 0.000000e+00 : f32
    %12 = vector.broadcast %cst_11 : f32 to vector<8x256xf32>
    %13 = arith.maximumf %11, %12 : vector<8x256xf32>
    %14 = arith.truncf %13 : vector<8x256xf32> to vector<8x256xbf16>
    %c0_12 = arith.constant 0 : index
    %c0_13 = arith.constant 0 : index
    %15 = vector.load %arg6[%c0_12, %c0_13] : memref<256x256xbf16, #tpu.memory_space<vmem>>, vector<256x256xbf16>
    %cst_14 = arith.constant dense<0.000000e+00> : vector<8x256xf32>
    %16 = tpu.matmul %14, %15, %cst_14 {dimension_numbers = #tpu.dot_dimension_numbers<[1], [0], [0], [1], [0, 0, 1, 1], [], []>} : vector<8x256xbf16>, vector<256x256xbf16>, vector<8x256xf32> -> vector<8x256xf32>
    %c0_15 = arith.constant 0 : index
    %c0_16 = arith.constant 0 : index
    %17 = vector.load %arg7[%c0_15, %c0_16] : memref<1x256xf32, #tpu.memory_space<vmem>>, vector<1x256xf32>
    %18 = vector.broadcast %17 : vector<1x256xf32> to vector<8x256xf32>
    %19 = arith.addf %16, %18 : vector<8x256xf32>
    %cst_17 = arith.constant 0.000000e+00 : f32
    %20 = vector.broadcast %cst_17 : f32 to vector<8x256xf32>
    %21 = arith.maximumf %19, %20 : vector<8x256xf32>
    %22 = arith.truncf %21 : vector<8x256xf32> to vector<8x256xbf16>
    %c0_18 = arith.constant 0 : index
    %c0_19 = arith.constant 0 : index
    %23 = vector.load %arg8[%c0_18, %c0_19] : memref<256x256xbf16, #tpu.memory_space<vmem>>, vector<256x256xbf16>
    %cst_20 = arith.constant dense<0.000000e+00> : vector<8x256xf32>
    %24 = tpu.matmul %22, %23, %cst_20 {dimension_numbers = #tpu.dot_dimension_numbers<[1], [0], [0], [1], [0, 0, 1, 1], [], []>} : vector<8x256xbf16>, vector<256x256xbf16>, vector<8x256xf32> -> vector<8x256xf32>
    %c0_21 = arith.constant 0 : index
    %c0_22 = arith.constant 0 : index
    %25 = vector.load %arg9[%c0_21, %c0_22] : memref<1x256xf32, #tpu.memory_space<vmem>>, vector<1x256xf32>
    %26 = vector.broadcast %25 : vector<1x256xf32> to vector<8x256xf32>
    %27 = arith.addf %24, %26 : vector<8x256xf32>
    %cst_23 = arith.constant 0.000000e+00 : f32
    %28 = vector.broadcast %cst_23 : f32 to vector<8x256xf32>
    %29 = arith.maximumf %27, %28 : vector<8x256xf32>
    %30 = arith.truncf %29 : vector<8x256xf32> to vector<8x256xbf16>
    %c0_24 = arith.constant 0 : index
    %c0_25 = arith.constant 0 : index
    %31 = vector.load %arg10[%c0_24, %c0_25] : memref<256x128xbf16, #tpu.memory_space<vmem>>, vector<256x128xbf16>
    %cst_26 = arith.constant dense<0.000000e+00> : vector<8x128xf32>
    %32 = tpu.matmul %30, %31, %cst_26 {dimension_numbers = #tpu.dot_dimension_numbers<[1], [0], [0], [1], [0, 0, 1, 1], [], []>} : vector<8x256xbf16>, vector<256x128xbf16>, vector<8x128xf32> -> vector<8x128xf32>
    %c0_27 = arith.constant 0 : index
    %c0_28 = arith.constant 0 : index
    %33 = vector.load %arg11[%c0_27, %c0_28] : memref<1x128xf32, #tpu.memory_space<vmem>>, vector<1x128xf32>
    %34 = vector.broadcast %33 : vector<1x128xf32> to vector<8x128xf32>
    %35 = arith.addf %32, %34 : vector<8x128xf32>
    %c0_29 = arith.constant 0 : index
    %c0_30 = arith.constant 0 : index
    %36 = vector.load %arg12[%c0_29, %c0_30] : memref<8x128xf32, #tpu.memory_space<vmem>>, vector<8x128xf32>
    tpu.vector_store %arg12[%c0_29, %c0_30], %35 {strides = array<i32>} : memref<8x128xf32, #tpu.memory_space<vmem>>, vector<8x128xf32>,
    return
  }
  func.func @transform_0(%arg0: i32) -> (i32, i32) {
    %c0_i32 = arith.constant 0 : i32
    %c0_i32_0 = arith.constant 0 : i32
    return %arg0, %c0_i32 : i32, i32
  }
  func.func @transform_1(%arg0: i32) -> (i32, i32) {
    %c0_i32 = arith.constant 0 : i32
    %c0_i32_0 = arith.constant 0 : i32
    return %arg0, %c0_i32 : i32, i32
  }
  func.func @transform_2(%arg0: i32) -> (i32, i32) {
    %c0_i32 = arith.constant 0 : i32
    %c0_i32_0 = arith.constant 0 : i32
    %c0_i32_1 = arith.constant 0 : i32
    return %c0_i32, %c0_i32_0 : i32, i32
  }
  func.func @transform_3(%arg0: i32) -> (i32, i32) {
    %c0_i32 = arith.constant 0 : i32
    %c0_i32_0 = arith.constant 0 : i32
    %c0_i32_1 = arith.constant 0 : i32
    return %c0_i32, %c0_i32_0 : i32, i32
  }
  func.func @transform_4(%arg0: i32) -> (i32, i32) {
    %c0_i32 = arith.constant 0 : i32
    %c0_i32_0 = arith.constant 0 : i32
    %c0_i32_1 = arith.constant 0 : i32
    return %c0_i32, %c0_i32_0 : i32, i32
  }
  func.func @transform_5(%arg0: i32) -> (i32, i32) {
    %c0_i32 = arith.constant 0 : i32
    %c0_i32_0 = arith.constant 0 : i32
    %c0_i32_1 = arith.constant 0 : i32
    return %c0_i32, %c0_i32_0 : i32, i32
  }
  func.func @transform_6(%arg0: i32) -> (i32, i32) {
    %c0_i32 = arith.constant 0 : i32
    %c0_i32_0 = arith.constant 0 : i32
    %c0_i32_1 = arith.constant 0 : i32
    return %c0_i32, %c0_i32_0 : i32, i32
  }
  func.func @transform_7(%arg0: i32) -> (i32, i32) {
    %c0_i32 = arith.constant 0 : i32
    %c0_i32_0 = arith.constant 0 : i32
    %c0_i32_1 = arith.constant 0 : i32
    return %c0_i32, %c0_i32_0 : i32, i32
  }
  func.func @transform_8(%arg0: i32) -> (i32, i32) {
    %c0_i32 = arith.constant 0 : i32
    %c0_i32_0 = arith.constant 0 : i32
    %c0_i32_1 = arith.constant 0 : i32
    return %c0_i32, %c0_i32_0 : i32, i32
  }
  func.func @transform_9(%arg0: i32) -> (i32, i32) {
    %c0_i32 = arith.constant 0 : i32
    %c0_i32_0 = arith.constant 0 : i32
    %c0_i32_1 = arith.constant 0 : i32
    return %c0_i32, %c0_i32_0 : i32, i32
  }
  func.func @transform_10(%arg0: i32) -> (i32, i32) {
    %c0_i32 = arith.constant 0 : i32
    %c0_i32_0 = arith.constant 0 : i32
    %c0_i32_1 = arith.constant 0 : i32
    return %c0_i32, %c0_i32_0 : i32, i32
  }
  func.func @transform_11(%arg0: i32) -> (i32, i32) {
    %c0_i32 = arith.constant 0 : i32
    %c0_i32_0 = arith.constant 0 : i32
    return %arg0, %c0_i32 : i32, i32
  }
}

</mosaic_0001>

<bundles_post_ra>
// kernel: critic_forward.1
= control target key start
LH: loop header
LB: loop body
LE: loop exit
PB: predicated region body
PF: predicated region fallthrough
CT: control target
= control target key end

     0   :  { %16 = vsyncpa [#allocation3], 0  ;;  %s1468_s0 = inlined_call_operand.vmem [shape: f32[8,15], index: 0, kind: input, shape index: {}]   ;;  %s1469_s1 = inlined_call_operand.vmem [shape: f32[8,4], index: 1, kind: input, shape index: {}]   ;;  %s1470_s2 = inlined_call_operand.hbm [shape: f32[15,256], index: 2, kind: input, shape index: {}]   ;;  %s1471_s3 = inlined_call_operand.vmem [shape: f32[4,256], index: 3, kind: input, shape index: {}]   ;;  %s1472_s4 = inlined_call_operand.vmem [shape: f32[1,256], index: 4, kind: input, shape index: {}]   ;;  %s1473_s5 = inlined_call_operand.hbm [shape: bf16[256,256], index: 5, kind: input, shape index: {}]   ;;  %s1474_s6 = inlined_call_operand.vmem [shape: f32[1,256], index: 6, kind: input, shape index: {}]   ;;  %s1475_s7 = inlined_call_operand.hbm [shape: bf16[256,256], index: 7, kind: input, shape index: {}]   ;;  %s1476_s8 = inlined_call_operand.vmem [shape: f32[1,256], index: 8, kind: input, shape index: {}]   ;;  %s1477_s9 = inlined_call_operand.hbm [shape: bf16[256,128], index: 9, kind: input, shape index: {}]   ;;  %s1478_s10 = inlined_call_operand.vmem [shape: f32[1,128], index: 10, kind: input, shape index: {}]   ;;  %s1479_s11 = inlined_call_operand.vmem [shape: f32[8,128], index: 11, kind: output, shape index: {}]  }
   0x1   :  { %17 = vsyncpa [#allocation5], 0 }
   0x2   :  { %18 = vsyncpa [#allocation8], 0  ;;  %s1301_s17 = smov [#allocation4]   ;;  %s1207_s21 = scalar_lea.hbm %s1473_s5, 4096 }
   0x3   :  { %s44_s18 = sshll.u32 %s1301_s17, 4  ;;  %p1208_p0 = scmp.ne.s32.totalorder %s1473_s5, %s1207_s21  ;;  %s45_s18 = int_to_ptr.vmem [resolvable:$true] %s44_s18 }
   0x4   :  { %p1211_p1 = scmp.lt.u32.totalorder %s1207_s21, %s1473_s5 }
   0x6   :  { %p1213_p2 = pnand %p1211_p1, %p1208_p0 }
   0x8   :  { %1216 = shalt.err (!%p1213_p2)
}
   0x9   :  { %s1217_s26 = scalar_lea.vmem %s45_s18, 4096  ;;  %p1222_p4 = scmp.lt.s32.totalorder %s45_s18, %s45_s18 }
   0xa   :  { %p1218_p3 = scmp.ne.s32.totalorder %s45_s18, %s1217_s26  ;;  %p1223_p5 = scmp.lt.s32.totalorder %s1217_s26, %s1217_s26 }
   0xc   :  { %p1224_p6 = por %p1223_p5, %p1222_p4 }
   0xe   :  { %p1225_p7 = pnand %p1224_p6, %p1218_p3 }
  0x10   :  { %1228 = shalt.err (!%p1225_p7)
}
  0x11   :  { %s1302_s27 = smov 128   ;;  %s1303_s28 = smov 8  }
  0x12   :  { %50 = dma.hbm_to_vmem [thread:$0]  %s1473_s5, 4096, %s45_s18, [#allocation5], %s1302_s27, %s1302_s27, %s1303_s28  }
  0x13   :  { %s1304_s12 = smov [#allocation2]   ;;  %s1229_s16 = scalar_lea.hbm %s1470_s2, 512 }
  0x14   :  { %s28_s13 = sshll.u32 %s1304_s12, 4  ;;  %p1230_p8 = scmp.ne.s32.totalorder %s1470_s2, %s1229_s16  ;;  %s29_s13 = int_to_ptr.vmem [resolvable:$true] %s28_s13 }
  0x15   :  { %p1233_p9 = scmp.lt.u32.totalorder %s1229_s16, %s1470_s2 }
  0x17   :  { %p1235_p10 = pnand %p1233_p9, %p1230_p8 }
  0x19   :  { %1238 = shalt.err (!%p1235_p10)
}
  0x1a   :  { %s1239_s22 = scalar_lea.vmem %s29_s13, 512  ;;  %p1244_p12 = scmp.lt.s32.totalorder %s29_s13, %s29_s13 }
  0x1b   :  { %p1240_p11 = scmp.ne.s32.totalorder %s29_s13, %s1239_s22  ;;  %p1245_p13 = scmp.lt.s32.totalorder %s1239_s22, %s1239_s22 }
  0x1d   :  { %p1246_p0 = por %p1245_p13, %p1244_p12 }
  0x1f   :  { %p1247_p1 = pnand %p1246_p0, %p1240_p11 }
  0x21   :  { %1250 = shalt.err (!%p1247_p1)
}
  0x22   :  { %s1305_s5 = smov 256   ;;  %s1306_s18 = smov 16  }
  0x23   :  { %34 = dma.hbm_to_vmem [thread:$0]  %s1470_s2, 512, %s29_s13, [#allocation3], %s1305_s5, %s1305_s5, %s1306_s18  }
  0x24   :  { %s1307_s25 = smov [#allocation6]   ;;  %s1308_s29 = smov [#allocation7]  }
  0x25   :  { %s58_s26 = sshll.u32 %s1307_s25, 4  ;;  %s72_s30 = sshll.u32 %s1308_s29, 4  ;;  %s59_s26 = int_to_ptr.vmem [resolvable:$true] %s58_s26  ;;  %s1400_s30 = int_to_ptr.vmem [resolvable:$true] %s72_s30 }
  0x26   :  { %s1251_s15 = scalar_lea.hbm %s1475_s7, 4096 }
  0x27   :  { %p1252_p2 = scmp.ne.s32.totalorder %s1475_s7, %s1251_s15  ;;  %p1255_p3 = scmp.lt.u32.totalorder %s1251_s15, %s1475_s7 }
  0x29   :  { %p1257_p4 = pnand %p1255_p3, %p1252_p2 }
  0x2b   :  { %1260 = shalt.err (!%p1257_p4)
}
  0x2c   :  { %s1261_s2 = scalar_lea.vmem %s59_s26, 4096  ;;  %p1266_p6 = scmp.lt.s32.totalorder %s59_s26, %s59_s26 }
  0x2d   :  { %p1262_p5 = scmp.ne.s32.totalorder %s59_s26, %s1261_s2  ;;  %p1267_p7 = scmp.lt.s32.totalorder %s1261_s2, %s1261_s2 }
  0x2f   :  { %p1268_p8 = por %p1267_p7, %p1266_p6 }
  0x31   :  { %p1269_p9 = pnand %p1268_p8, %p1262_p5 }
  0x33   :  { %1272 = shalt.err (!%p1269_p9)
}
  0x34   :  { %64 = dma.hbm_to_vmem [thread:$0]  %s1475_s7, 4096, %s59_s26, [#allocation5], %s1302_s27, %s1302_s27, %s1303_s28  }
  0x35   :  { %s1273_s18 = scalar_lea.hbm %s1477_s9, 2048 }
  0x36   :  { %p1274_p10 = scmp.ne.s32.totalorder %s1477_s9, %s1273_s18  ;;  %p1277_p11 = scmp.lt.u32.totalorder %s1273_s18, %s1477_s9 }
  0x38   :  { %p1279_p12 = pnand %p1277_p11, %p1274_p10 }
  0x3a   :  { %1282 = shalt.err (!%p1279_p12)
}
  0x3b   :  { %s1283_s12 = scalar_lea.vmem %s1400_s30, 2048  ;;  %p1288_p0 = scmp.lt.s32.totalorder %s1400_s30, %s1400_s30 }
  0x3c   :  { %p1284_p13 = scmp.ne.s32.totalorder %s1400_s30, %s1283_s12  ;;  %p1289_p1 = scmp.lt.s32.totalorder %s1283_s12, %s1283_s12 }
  0x3e   :  { %p1290_p2 = por %p1289_p1, %p1288_p0 }
  0x40   :  { %p1291_p3 = pnand %p1290_p2, %p1284_p13 }
  0x42   :  { %1294 = shalt.err (!%p1291_p3)
}
  0x43   :  { %s1309_s7 = smov 64   ;;  %s1310_s27 = smov 4  }
  0x44   :  { %78 = dma.hbm_to_vmem [thread:$0]  %s1477_s9, 2048, %s1400_s30, [#allocation8], %s1309_s7, %s1309_s7, %s1310_s27  }
  0x45   :  { %1295 = dma.done.wait [#allocation3], 512  }
  0x46   :  { %1296 = vsyncadd [#allocation3], 4294966784 }
  0x47   :  { %1297 = dma.done.wait [#allocation5], 8192  }
  0x48   :  { %1298 = vsyncadd [#allocation5], 4294959104 }
  0x49   :  { %1299 = dma.done.wait [#allocation8], 2048  }
  0x4a   :  { %1300 = vsyncadd [#allocation8], 4294965248  ;;  %v1311_v0 = vmov 0.0   ;;  %vm188_vm0 = vcmask 1046528   ;;  %v101_v1 = vld [vmem:[%s1471_s3] sm:$0xff]  ;;  %vm108_vm1 = vcmask 1043456  }
  0x4b   :  { %177 = vmatprep.mubr.f32.mxu0 %v1311_v0  ;;  %v95_v2 = vld [vmem:[%s1469_s1] sm:$0xff]  ;;  %v98_v3 = vld [vmem:[#allocation2 + $0x8] sm:$0xff]  ;;  %v103_v4 = vcombine.high %v101_v1, %v101_v1  ;;  %v100_v6 = vld [vmem:[#allocation2 + $0x18] sm:$0x7f]  ;;  %vm104_vm2 = vcmask 31744   ;;  %vm1312_vm3 = vmmov 1  }
  0x4c   :  { %v96_v5 = vmul.f32 0.5, %v95_v2  ;;  %v97_v7 = vld [vmem:[#allocation2] sm:$0xff]  ;;  %v99_v8 = vld [vmem:[#allocation2 + $0x10] sm:$0x7f]  ;;  %v1074_v9 = vpack.c.bf16 %v100_v6, %v98_v3  ;;  %vm1075_vm4 = vmpackc.low %vm188_vm0, %vm1312_vm3  ;;  %vm184_vm5 = vcmask 121856  }
  0x4d   :  { %v1077_v10 = vpack.c.bf16 %v99_v8, %v97_v7  ;;  %965 = vmatprep.subr.msk.mxu0 %vm108_vm1, %v103_v4  ;;  %v1095_v11 = vld [vmem:[#allocation4 + $0x4] ss:$8 sps:$4 sm:$0xff]   ;;  %v1097_v12 = vld [vmem:[#allocation4] ss:$8 sps:$4 sm:$0xff]   ;;  %v1098_v13 = vld [vmem:[#allocation4 + $0x14] ss:$8 sps:$4 sm:$0xff]   ;;  %v268_v8 = vlaneseq }
  0x4e   :  { %966 = vmatpush1.msk.msra.mxu0 %vm108_vm1, %v101_v1  ;;  %488 = vmatprep.subr.bf16.mxu1 %v1095_v11  ;;  %v1100_v14 = vld [vmem:[#allocation4 + $0x10] ss:$8 sps:$4 sm:$0xff]   ;;  %v1101_v15 = vld [vmem:[#allocation4 + $0x24] ss:$8 sps:$4 sm:$0xff]   ;;  %v1103_v17 = vld [vmem:[#allocation4 + $0x20] ss:$8 sps:$4 sm:$0xff]  }
  0x4f   :  { %967 = vmatmul.mubr.msk.f32.vlgmr.msra.gmra.mrb[0].mxu0 %vm104_vm2, %v96_v5  ;;  %1076 = vmatprep.subr.msk.bf16.mxu0 %vm1075_vm4, %v1074_v9  ;;  %v94_v16 = vld [vmem:[%s1468_s0] sm:$0xff]  ;;  %v1104_v18 = vld [vmem:[#allocation4 + $0x34] ss:$8 sps:$4 sm:$0xff]   ;;  %v1106_v19 = vld [vmem:[#allocation4 + $0x30] ss:$8 sps:$4 sm:$0xff]   ;;  %v269_v9 = vshrl.u32 %v268_v8, 7 }
  0x50   :  { %1079 = vmatpush1.bf16.msk.msra.mxu0 %vm1075_vm4, %v1077_v10  ;;  %259 = vmatprep.mubr.f32.mxu0 %v1311_v0  ;;  %v1107_v20 = vld [vmem:[#allocation4 + $0x44] ss:$8 sps:$4 sm:$0xff]   ;;  %v1109_v21 = vld [vmem:[#allocation4 + $0x40] ss:$8 sps:$4 sm:$0xff]   ;;  %v1110_v22 = vld [vmem:[#allocation4 + $0x54] ss:$8 sps:$4 sm:$0xff]  }
  0x51   :  { %489 = vmatpush1.bf16.msra.mxu1 %v1097_v12  ;;  %v1112_v23 = vld [vmem:[#allocation4 + $0x50] ss:$8 sps:$4 sm:$0xff]   ;;  %v1113_v24 = vld [vmem:[#allocation4 + $0x64] ss:$8 sps:$4 sm:$0xff]   ;;  %v1115_v25 = vld [vmem:[#allocation4 + $0x60] ss:$8 sps:$4 sm:$0xff]  }
  0x52   :  { %490 = vmatprep.subr.bf16.mxu1 %v1098_v13  ;;  %v1116_v26 = vld [vmem:[#allocation4 + $0x74] ss:$8 sps:$4 sm:$0xff]   ;;  %v1118_v27 = vld [vmem:[#allocation4 + $0x70] ss:$8 sps:$4 sm:$0xff]   ;;  %v1119_v28 = vld [vmem:[#allocation4 + $0x84] ss:$8 sps:$4 sm:$0xff]  }
  0x53   :  { %v1121_v29 = vld [vmem:[#allocation4 + $0x80] ss:$8 sps:$4 sm:$0xff]   ;;  %v1122_v30 = vld [vmem:[#allocation4 + $0x94] ss:$8 sps:$4 sm:$0xff]   ;;  %v1124_v31 = vld [vmem:[#allocation4 + $0x90] ss:$8 sps:$4 sm:$0xff]  }
  0x54   :  { %v1125_v32 = vld [vmem:[#allocation4 + $0xa4] ss:$8 sps:$4 sm:$0xff]   ;;  %v1127_v33 = vld [vmem:[#allocation4 + $0xa0] ss:$8 sps:$4 sm:$0xff]   ;;  %v1128_v34 = vld [vmem:[#allocation4 + $0xb4] ss:$8 sps:$4 sm:$0xff]  }
  0x55   :  { %491 = vmatpush1.bf16.msra.mxu1 %v1100_v14  ;;  %v1130_v35 = vld [vmem:[#allocation4 + $0xb0] ss:$8 sps:$4 sm:$0xff]   ;;  %v1131_v36 = vld [vmem:[#allocation4 + $0xc4] ss:$8 sps:$4 sm:$0xff]   ;;  %v1133_v37 = vld [vmem:[#allocation4 + $0xc0] ss:$8 sps:$4 sm:$0xff]  }
  0x56   :  { %492 = vmatprep.subr.bf16.mxu1 %v1101_v15  ;;  %v1134_v38 = vld [vmem:[#allocation4 + $0xd4] ss:$8 sps:$4 sm:$0xff]   ;;  %v1136_v39 = vld [vmem:[#allocation4 + $0xd0] ss:$8 sps:$4 sm:$0xff]   ;;  %v1137_v40 = vld [vmem:[#allocation4 + $0xe4] ss:$8 sps:$4 sm:$0xff]  }
  0x57   :  { %970 = vmatmul.mubr.msk.f32.vlgmr.msra.gmra.mrb[0].mxu0 %vm184_vm5, %v94_v16  ;;  %v1139_v41 = vld [vmem:[#allocation4 + $0xe0] ss:$8 sps:$4 sm:$0xff]   ;;  %v1140_v42 = vld [vmem:[#allocation4 + $0xf4] ss:$8 sps:$4 sm:$0xff]   ;;  %v1142_v43 = vld [vmem:[#allocation4 + $0xf0] ss:$8 sps:$4 sm:$0xff]  }
  0x58   :  { %v1143_v44 = vld [vmem:[#allocation6] ss:$8 sps:$4 sm:$0xff]   ;;  %v1145_v45 = vld [vmem:[#allocation6 + $0x4] ss:$8 sps:$4 sm:$0xff]   ;;  %v1148_v46 = vld [vmem:[#allocation6 + $0x14] ss:$8 sps:$4 sm:$0xff]  }
  0x59   :  { %493 = vmatpush1.bf16.msra.mxu1 %v1103_v17  ;;  %737 = vmatprep.subr.bf16.mxu0 %v1145_v45  ;;  %v1146_v47 = vld [vmem:[#allocation6 + $0x10] ss:$8 sps:$4 sm:$0xff]   ;;  %v1151_v48 = vld [vmem:[#allocation6 + $0x24] ss:$8 sps:$4 sm:$0xff]   ;;  %v1149_v49 = vld [vmem:[#allocation6 + $0x20] ss:$8 sps:$4 sm:$0xff]  }
  0x5a   :  { %494 = vmatprep.subr.bf16.mxu1 %v1104_v18  ;;  %738 = vmatpush1.bf16.msra.mxu0 %v1143_v44  ;;  %v1154_v50 = vld [vmem:[#allocation6 + $0x34] ss:$8 sps:$4 sm:$0xff]   ;;  %v1152_v51 = vld [vmem:[#allocation6 + $0x30] ss:$8 sps:$4 sm:$0xff]   ;;  %v1157_v52 = vld [vmem:[#allocation6 + $0x44] ss:$8 sps:$4 sm:$0xff]  }
  0x5b   :  { %739 = vmatprep.subr.bf16.mxu0 %v1148_v46  ;;  %v1155_v53 = vld [vmem:[#allocation6 + $0x40] ss:$8 sps:$4 sm:$0xff]   ;;  %v1160_v54 = vld [vmem:[#allocation6 + $0x54] ss:$8 sps:$4 sm:$0xff]   ;;  %v1158_v55 = vld [vmem:[#allocation6 + $0x50] ss:$8 sps:$4 sm:$0xff]  }
  0x5c   :  { %v1163_v56 = vld [vmem:[#allocation6 + $0x64] ss:$8 sps:$4 sm:$0xff]   ;;  %v1161_v57 = vld [vmem:[#allocation6 + $0x60] ss:$8 sps:$4 sm:$0xff]   ;;  %v1166_v58 = vld [vmem:[#allocation6 + $0x74] ss:$8 sps:$4 sm:$0xff]  }
  0x5d   :  { %495 = vmatpush1.bf16.msra.mxu1 %v1106_v19  ;;  %v1164_v59 = vld [vmem:[#allocation6 + $0x70] ss:$8 sps:$4 sm:$0xff]   ;;  %v1169_v60 = vld [vmem:[#allocation6 + $0x84] ss:$8 sps:$4 sm:$0xff]   ;;  %v1167_v61 = vld [vmem:[#allocation6 + $0x80] ss:$8 sps:$4 sm:$0xff]  }
  0x5e   :  { %496 = vmatprep.subr.bf16.mxu1 %v1107_v20  ;;  %740 = vmatpush1.bf16.msra.mxu0 %v1146_v47  ;;  %v1172_v62 = vld [vmem:[#allocation6 + $0x94] ss:$8 sps:$4 sm:$0xff]   ;;  %v1170_v63 = vld [vmem:[#allocation6 + $0x90] ss:$8 sps:$4 sm:$0xff]   ;;  %v1175_v0 = vld [vmem:[#allocation6 + $0xa4] ss:$8 sps:$4 sm:$0xff]  }
  0x5f   :  { %741 = vmatprep.subr.bf16.mxu0 %v1151_v48  ;;  %v1173_v1 = vld [vmem:[#allocation6 + $0xa0] ss:$8 sps:$4 sm:$0xff]   ;;  %v1178_v2 = vld [vmem:[#allocation6 + $0xb4] ss:$8 sps:$4 sm:$0xff]   ;;  %v1176_v3 = vld [vmem:[#allocation6 + $0xb0] ss:$8 sps:$4 sm:$0xff]  }
  0x60   :  { %v1181_v4 = vld [vmem:[#allocation6 + $0xc4] ss:$8 sps:$4 sm:$0xff]   ;;  %v1179_v5 = vld [vmem:[#allocation6 + $0xc0] ss:$8 sps:$4 sm:$0xff]   ;;  %v1184_v6 = vld [vmem:[#allocation6 + $0xd4] ss:$8 sps:$4 sm:$0xff]  }
  0x61   :  { %497 = vmatpush1.bf16.msra.mxu1 %v1109_v21  ;;  %v1182_v7 = vld [vmem:[#allocation6 + $0xd0] ss:$8 sps:$4 sm:$0xff]   ;;  %v1443_v10 = vsub.s32 0, %v269_v9  ;;  %v266_v11 = vld [vmem:[%s1472_s4] sm:$0x3]  ;;  %v1448_v12 = vsub.s32 1, %v269_v9 }
  0x62   :  { %498 = vmatprep.subr.bf16.mxu1 %v1110_v22  ;;  %742 = vmatpush1.bf16.msra.mxu0 %v1149_v49 }
  0x63   :  { %743 = vmatprep.subr.bf16.mxu0 %v1154_v50  ;;  %v271_v13 = vrot.slane %v266_v11, %v1443_v10  ;;  %v275_v14 = vrot.slane %v266_v11, %v1448_v12 }
  0x65   :  { %499 = vmatpush1.bf16.msra.mxu1 %v1112_v23  ;;  %v1187_v23 = vld [vmem:[#allocation6 + $0xe4] ss:$8 sps:$4 sm:$0xff]  }
  0x66   :  { %500 = vmatprep.subr.bf16.mxu1 %v1113_v24  ;;  %744 = vmatpush1.bf16.msra.mxu0 %v1152_v51  ;;  %v1185_v24 = vld [vmem:[#allocation6 + $0xe0] ss:$8 sps:$4 sm:$0xff]  }
  0x67   :  { %745 = vmatprep.subr.bf16.mxu0 %v1157_v52  ;;  %v1203_v52 = vld [vmem:[#allocation7 + $0x70] sm:$0xff]  }
  0x69   :  { %501 = vmatpush1.bf16.msra.mxu1 %v1115_v25  ;;  %v1190_v25 = vld [vmem:[#allocation6 + $0xf4] ss:$8 sps:$4 sm:$0xff]  }
  0x6a   :  { %502 = vmatprep.subr.bf16.mxu1 %v1116_v26  ;;  %746 = vmatpush1.bf16.msra.mxu0 %v1155_v53  ;;  %v1188_v26 = vld [vmem:[#allocation6 + $0xf0] ss:$8 sps:$4 sm:$0xff]  }
  0x6b   :  { %747 = vmatprep.subr.bf16.mxu0 %v1160_v54  ;;  %v1204_v53 = vld [vmem:[#allocation7 + $0x30] sm:$0xff]   ;;  %v1205_v54 = vld [vmem:[#allocation7 + $0x78] sm:$0xff]  }
  0x6d   :  { %503 = vmatpush1.bf16.msra.mxu1 %v1118_v27  ;;  %v1191_v27 = vld [vmem:[#allocation7 + $0x40] sm:$0xff]  }
  0x6e   :  { %504 = vmatprep.subr.bf16.mxu1 %v1119_v28  ;;  %748 = vmatpush1.bf16.msra.mxu0 %v1158_v55  ;;  %v1192_v28 = vld [vmem:[#allocation7] sm:$0xff]   ;;  %v1206_v55 = vld [vmem:[#allocation7 + $0x38] sm:$0xff]  }
  0x6f   :  { %749 = vmatprep.subr.bf16.mxu0 %v1163_v56  ;;  %v565_v56 = vld [vmem:[%s1476_s8] sm:$0x3] }
  0x71   :  { %505 = vmatpush1.bf16.msra.mxu1 %v1121_v29  ;;  %v1193_v29 = vld [vmem:[#allocation7 + $0x48] sm:$0xff]  }
  0x72   :  { %506 = vmatprep.subr.bf16.mxu1 %v1122_v30  ;;  %750 = vmatpush1.bf16.msra.mxu0 %v1161_v57  ;;  %v1194_v30 = vld [vmem:[#allocation7 + $0x8] sm:$0xff]   ;;  %v570_v57 = vrot.slane %v565_v56, %v1443_v10 }
  0x73   :  { %751 = vmatprep.subr.bf16.mxu0 %v1166_v58  ;;  %v574_v58 = vrot.slane %v565_v56, %v1448_v12 }
  0x75   :  { %507 = vmatpush1.bf16.msra.mxu1 %v1124_v31  ;;  %v1195_v31 = vld [vmem:[#allocation7 + $0x50] sm:$0xff]  }
  0x76   :  { %508 = vmatprep.subr.bf16.mxu1 %v1125_v32  ;;  %752 = vmatpush1.bf16.msra.mxu0 %v1164_v59  ;;  %v1196_v32 = vld [vmem:[#allocation7 + $0x10] sm:$0xff]  }
  0x77   :  { %753 = vmatprep.subr.bf16.mxu0 %v1169_v60 }
  0x79   :  { %509 = vmatpush1.bf16.msra.mxu1 %v1127_v33  ;;  %v1197_v33 = vld [vmem:[#allocation7 + $0x58] sm:$0xff]  }
  0x7a   :  { %510 = vmatprep.subr.bf16.mxu1 %v1128_v34  ;;  %754 = vmatpush1.bf16.msra.mxu0 %v1167_v61  ;;  %v1198_v34 = vld [vmem:[#allocation7 + $0x18] sm:$0xff]  }
  0x7b   :  { %755 = vmatprep.subr.bf16.mxu0 %v1172_v62 }
  0x7d   :  { %511 = vmatpush1.bf16.msra.mxu1 %v1130_v35  ;;  %v1199_v35 = vld [vmem:[#allocation7 + $0x60] sm:$0xff]  }
  0x7e   :  { %512 = vmatprep.subr.bf16.mxu1 %v1131_v36  ;;  %756 = vmatpush1.bf16.msra.mxu0 %v1170_v63  ;;  %v1200_v36 = vld [vmem:[#allocation7 + $0x20] sm:$0xff]  }
  0x7f   :  { %757 = vmatprep.subr.bf16.mxu0 %v1175_v0 }
  0x81   :  { %513 = vmatpush1.bf16.msra.mxu1 %v1133_v37  ;;  %v1201_v37 = vld [vmem:[#allocation7 + $0x68] sm:$0xff]  }
  0x82   :  { %514 = vmatprep.subr.bf16.mxu1 %v1134_v38  ;;  %758 = vmatpush1.bf16.msra.mxu0 %v1173_v1  ;;  %v1202_v38 = vld [vmem:[#allocation7 + $0x28] sm:$0xff]  }
  0x83   :  { %759 = vmatprep.subr.bf16.mxu0 %v1178_v2 }
  0x85   :  { %515 = vmatpush1.bf16.msra.mxu1 %v1136_v39  ;;  %v316_v39 = vld [vmem:[%s1474_s6] sm:$0x3] }
  0x86   :  { %516 = vmatprep.subr.bf16.mxu1 %v1137_v40  ;;  %760 = vmatpush1.bf16.msra.mxu0 %v1176_v3  ;;  %v321_v40 = vrot.slane %v316_v39, %v1443_v10 }
  0x87   :  { %761 = vmatprep.subr.bf16.mxu0 %v1181_v4 }
  0x89   :  { %517 = vmatpush1.bf16.msra.mxu1 %v1139_v41  ;;  %v325_v41 = vrot.slane %v316_v39, %v1448_v12 }
  0x8a   :  { %518 = vmatprep.subr.bf16.mxu1 %v1140_v42  ;;  %762 = vmatpush1.bf16.msra.mxu0 %v1179_v5 }
  0x8b   :  { %763 = vmatprep.subr.bf16.mxu0 %v1184_v6  ;;  %v1035_v6 = vld [vmem:[%s1478_s10] ss:$0 sm:$0xff] }
  0x8d   :  { %519 = vmatpush1.bf16.msra.mxu1 %v1142_v43 }
  0x8e   :  { %764 = vmatpush1.bf16.msra.mxu0 %v1182_v7  ;;  %1052 = vmatprep.subr.bf16.mxu1 %v1191_v27 }
  0x8f   :  { %765 = vmatprep.subr.bf16.mxu0 %v1187_v23 }
  0x92   :  { %766 = vmatpush1.bf16.msra.mxu0 %v1185_v24 }
  0x93   :  { %767 = vmatprep.subr.bf16.mxu0 %v1190_v25 }
  0x96   :  { %768 = vmatpush1.bf16.msra.mxu0 %v1188_v26 }
 0x12a   :  { %v261_v15 = vpop.f32.mrb[0].mxu0 }
 0x12b   :  { %v278_v16 = vadd.f32 %v271_v13, %v261_v15  ;;  %v263_v17 = vpop.f32.mrb[1].mxu0 }
 0x12c   :  { %v279_v18 = vadd.f32 %v275_v14, %v263_v17 }
 0x12d   :  { %v280_v19 = vmax.f32 %v278_v16, 0.0 }
 0x12e   :  { %v281_v20 = vmax.f32 %v279_v18, 0.0 }
 0x12f   :  { %v282_v22 = vpack.c.bf16 %v280_v19, %v280_v19 }
 0x130   :  { %v283_v21 = vpack.c.bf16 %v281_v20, %v281_v20 }
 0x132   :  { %520 = vmatprep.mubr.bf16.mxu1 %v283_v21 }
 0x133   :  { %521 = vmatmul.mubr.bf16.vlgmr.msra.gmra.mrb[0].mxu1 %v282_v22 }
 0x134   :  { %1053 = vmatpush3.bf16.msra.mxu1 %v1192_v28 }
 0x135   :  { %1054 = vmatprep.subr.bf16.mxu1 %v1193_v29 }
 0x138   :  { %1055 = vmatpush3.bf16.msra.mxu1 %v1194_v30 }
 0x139   :  { %1056 = vmatprep.subr.bf16.mxu1 %v1195_v31 }
 0x13c   :  { %1057 = vmatpush3.bf16.msra.mxu1 %v1196_v32 }
 0x13d   :  { %1058 = vmatprep.subr.bf16.mxu1 %v1197_v33 }
 0x140   :  { %1059 = vmatpush3.bf16.msra.mxu1 %v1198_v34 }
 0x141   :  { %1060 = vmatprep.subr.bf16.mxu1 %v1199_v35 }
 0x144   :  { %1061 = vmatpush3.bf16.msra.mxu1 %v1200_v36 }
 0x145   :  { %1062 = vmatprep.subr.bf16.mxu1 %v1201_v37 }
 0x148   :  { %1063 = vmatpush3.bf16.msra.mxu1 %v1202_v38 }
 0x149   :  { %1064 = vmatprep.subr.bf16.mxu1 %v1203_v52 }
 0x14c   :  { %1065 = vmatpush3.bf16.msra.mxu1 %v1204_v53 }
 0x14d   :  { %1066 = vmatprep.subr.bf16.mxu1 %v1205_v54 }
 0x150   :  { %1067 = vmatpush3.bf16.msra.mxu1 %v1206_v55 }
 0x206   :  { %v522_v42 = vpop.f32.mrb[0].mxu1 }
 0x207   :  { %v523_v43 = vadd.f32 %v522_v42, %v321_v40  ;;  %v524_v44 = vpop.f32.mrb[1].mxu1 }
 0x208   :  { %v525_v45 = vadd.f32 %v524_v44, %v325_v41  ;;  %v526_v46 = vpop.f32.mrb[2].mxu1 }
 0x209   :  { %v529_v47 = vmax.f32 %v523_v43, 0.0  ;;  %v527_v48 = vpop.f32.mrb[3].mxu1 }
 0x20a   :  { %v530_v49 = vmax.f32 %v525_v45, 0.0 }
 0x20b   :  { %v531_v51 = vpack.c.bf16 %v529_v47, %v529_v47 }
 0x20c   :  { %v532_v50 = vpack.c.bf16 %v530_v49, %v530_v49 }
 0x20e   :  { %769 = vmatprep.mubr.bf16.mxu0 %v532_v50 }
 0x20f   :  { %770 = vmatmul.mubr.bf16.vlgmr.msra.gmra.mrb[4].mxu0 %v531_v51 }
 0x2e2   :  { %v771_v59 = vpop.f32.mrb[4].mxu0 }
 0x2e3   :  { %v772_v60 = vadd.f32 %v771_v59, %v570_v57  ;;  %v773_v61 = vpop.f32.mrb[5].mxu0 }
 0x2e4   :  { %v774_v62 = vadd.f32 %v773_v61, %v574_v58  ;;  %v775_v63 = vpop.f32.mrb[6].mxu0 }
 0x2e5   :  { %v778_v0 = vmax.f32 %v772_v60, 0.0  ;;  %v776_v1 = vpop.f32.mrb[7].mxu0 }
 0x2e6   :  { %v779_v2 = vmax.f32 %v774_v62, 0.0 }
 0x2e7   :  { %v780_v4 = vpack.c.bf16 %v778_v0, %v778_v0 }
 0x2e8   :  { %v781_v3 = vpack.c.bf16 %v779_v2, %v779_v2 }
 0x2ea   :  { %949 = vmatprep.mubr.bf16.mxu1 %v781_v3 }
 0x2eb   :  { %950 = vmatmul.mubr.bf16.vlgmr.msra.gmra.mrb[4].mxu1 %v780_v4 }
 0x3be   :  { %v1068_v5 = vpop.f32.mrb[4].mxu1 }
 0x3bf   :  { %v1069_v7 = vpop.f32.mrb[5].mxu1 }
 0x3c0   :  { %v1070_v8 = vadd.f32 %v1069_v7, %v1068_v5  ;;  %v1071_v9 = vpop.f32.mrb[6].mxu1 }
 0x3c1   :  { %v1072_v10 = vpop.f32.mrb[7].mxu1 }
 0x3c2   :  { %v952_v11 = vadd.f32 %v1070_v8, %v1035_v6 }
 0x3c4   :  { %957 = vst [vmem:[%s1479_s11] sm:$0xff] %v952_v11 }
 0x3c5   :  { %962 = vsyncpa [#allocation3], 1 }
 0x3c6   :  { %963 = vsyncpa [#allocation5], 1 }
 0x3c7   :  { %964 = vsyncpa [#allocation8], 1 }

</bundles_post_ra>
